<compile_context>
chip_gen: v7x
topology: tpu7x:2x2x1
jax: 0.10.0
libtpu: 0.0.40
codegen_flags: <defaults>
</compile_context>

<pallas_src>
import functools

import jax
import jax.numpy as jnp
from jax.experimental import pallas as pl
from jax.experimental.pallas import tpu as pltpu


def _round_up(x, m):
    return pl.cdiv(x, m) * m


def _categorical_probs_kernel(logits_ref, probs_ref, *, inv_temperature):
    """One tile of rows: probs = softmax(logits * inv_temperature, axis=-1)."""
    x = logits_ref[...].astype(jnp.float32)
    # Numerically stable softmax along the lane (last) axis.  For t > 0,
    # softmax(x / t) == exp((x - max(x)) * (1/t)) / sum(...), so the scale is
    # folded into the exp argument and skipped when t == 1 (trace-time check).
    row_max = jnp.max(x, axis=-1, keepdims=True)
    z = x - row_max
    if inv_temperature != 1.0:          # Python literal, resolved at trace time
        z = z * inv_temperature
    e = jnp.exp(z)
    row_sum = jnp.sum(e, axis=-1, keepdims=True)
    # Exact divide: the kernel is HBM-bandwidth bound with huge VALU/EUP slack,
    # so the approx reciprocal saved nothing and only added ~2^-12 error.
    probs_ref[...] = (e / row_sum).astype(probs_ref.dtype)


def categorical_net_forward(logits, *, temperature=1.0, top_p=1.0, top_k=0,
                            block_rows=None, out_dtype=None):
    """Pallas implementation of CategoricalNet.forward for default hparams.

    logits: (..., V) float array, V is the category axis.
    Returns probs with the same shape, rows summing to 1.
    """
    # In the PyTorch module, top_k filtering needs topk and top_p (strictly
    # inside (0, 1)) needs a full descending sort + cumsum along the category
    # axis; top_p == 1 (default) is a provable no-op and top_p <= 0 / > 1 skips
    # the branch entirely, so both default paths reduce to plain softmax.
    if top_k > 0 or (0.0 < top_p < 1.0):
        # TODO(synk): sort/cumsum-based top_k / top_p filtering needs a full
        # sort along the category axis and has no clean Pallas equivalent;
        # only the default (no-filtering) configuration is implemented.
        raise NotImplementedError("top_k>0 / 0<top_p<1 filtering not implemented")
    if not temperature > 0:
        raise ValueError("temperature must be > 0")

    orig_shape = logits.shape
    if logits.ndim != 2:
        logits = logits.reshape(-1, orig_shape[-1])
    B, V = logits.shape
    if out_dtype is None:
        out_dtype = logits.dtype   # bf16 in -> bf16 out (bandwidth-bound win)

    # Lane-padded tile width the compiler will actually allocate in VMEM.
    Vp = int(_round_up(V, 128))

    # Auto-size the row tile: ~4 MiB per f32 buffer (bandwidth-bound streaming
    # kernel; amortizes the ~0.35 us fixed per-step overhead), multiple of 8
    # sublanes.  Cap at ceil(B/2) rows so the grid has >= 2 steps and the
    # "parallel" axis can be sharded across v7x's two TensorCores.
    if block_rows is None:
        target_bytes = 4 << 20
        block_rows = max(8, min(4096, (target_bytes // (Vp * 4)) // 8 * 8))
    block_rows = int(block_rows)
    if B <= 8:
        block_rows = B                                  # full-dim block is legal
    else:
        block_rows = min(block_rows, int(_round_up(pl.cdiv(B, 2), 8)))
        block_rows = max(block_rows, 8)                 # sublane granularity

    grid = (int(pl.cdiv(B, block_rows)),)               # partial tail block OK

    kernel = functools.partial(
        _categorical_probs_kernel,
        inv_temperature=float(1.0 / temperature),       # Python literal, not jnp
    )

    # VMEM budget: double-buffered in/out tiles + in-kernel f32 temporaries
    # (upcast copy, exp, quotient) + small headroom; capped comfortably below
    # v7x's 64 MiB per-TC VMEM.
    in_bytes = block_rows * Vp * logits.dtype.itemsize
    out_bytes = block_rows * Vp * jnp.dtype(out_dtype).itemsize
    tmp_bytes = 3 * block_rows * Vp * 4
    vmem_limit = 2 * (in_bytes + out_bytes) + tmp_bytes + (2 << 20)
    vmem_limit = int(min(max(vmem_limit, 16 << 20), 48 << 20))

    # TODO(synk): if the consumer only needs sampled actions / log_prob /
    # entropy, fuse that per-row reduction here instead of materializing the
    # full (B, V) probs matrix (halves HBM traffic for this mem-bound kernel).
    probs = pl.pallas_call(
        kernel,
        out_shape=jax.ShapeDtypeStruct((B, V), out_dtype),
        grid_spec=pltpu.PrefetchScalarGridSpec(
            num_scalar_prefetch=0,
            grid=grid,
            in_specs=[pl.BlockSpec((block_rows, V), lambda i: (i, 0))],
            out_specs=pl.BlockSpec((block_rows, V), lambda i: (i, 0)),
        ),
        compiler_params=pltpu.CompilerParams(
            dimension_semantics=("parallel",),
            vmem_limit_bytes=vmem_limit,
        ),
    )(logits)

    if probs.shape != orig_shape:
        probs = probs.reshape(orig_shape)
    return probs


if __name__ == "__main__":
    # Small shapes; B and V deliberately NOT tile-aligned so the partial last
    # row block (B=20 with block_rows=16 -> grid=(2,)) and the non-128-multiple
    # category axis (V=200) paths are both exercised.
    B, V = 20, 200
    key = jax.random.PRNGKey(0)
    logits = jax.random.normal(key, (B, V), dtype=jnp.float32) * 3.0

    # Default config: temperature=1, top_p=1, top_k=0.
    probs = categorical_net_forward(logits, temperature=1.0, top_p=1.0, top_k=0)
    probs = jax.block_until_ready(probs)

    ref = jax.nn.softmax(logits, axis=-1)
    assert probs.shape == (B, V)
    assert jnp.allclose(probs, ref, atol=1e-4, rtol=1e-4)
    assert jnp.allclose(jnp.sum(probs, axis=-1), 1.0, atol=1e-4)

    # Non-default temperature exercises the folded-scale path.
    t = 0.7
    probs_t = jax.block_until_ready(categorical_net_forward(logits, temperature=t))
    ref_t = jax.nn.softmax(logits / t, axis=-1)
    assert jnp.allclose(probs_t, ref_t, atol=1e-4, rtol=1e-4)
    assert jnp.allclose(jnp.sum(probs_t, axis=-1), 1.0, atol=1e-4)

    print("KERNEL_OK")
</pallas_src>

<mosaic_0001>
module attributes {stable_mosaic.version = 11 : i64} {
  func.func @_categorical_probs_kernel(%arg0: i32, %arg1: memref<16x200xf32, #tpu.memory_space<vmem>>, %arg2: memref<16x200xf32, #tpu.memory_space<vmem>>) attributes {dimension_semantics = [#tpu.dimension_semantics<parallel>], iteration_bounds = array<i64: 2>, scalar_prefetch = 0 : i64, scratch_operands = 0 : i64, tpu.core_type = #tpu.core_type<tc>, window_params = [{transform_indices = @transform_0, window_bounds = array<i64: 16, 200>}, {transform_indices = @transform_1, window_bounds = array<i64: 16, 200>}]} {
    %c0 = arith.constant 0 : index
    %c0_0 = arith.constant 0 : index
    %0 = vector.load %arg1[%c0, %c0_0] : memref<16x200xf32, #tpu.memory_space<vmem>>, vector<16x200xf32>
    %cst = arith.constant dense<0xFF800000> : vector<16xf32>
    %1 = vector.multi_reduction <maximumf>, %0, %cst [1] : vector<16x200xf32> to vector<16xf32>
    %2 = vector.shape_cast %1 : vector<16xf32> to vector<16x1xf32>
    %3 = vector.broadcast %2 : vector<16x1xf32> to vector<16x200xf32>
    %4 = arith.subf %0, %3 : vector<16x200xf32>
    %5 = math.exp %4 : vector<16x200xf32>
    %cst_1 = arith.constant dense<0.000000e+00> : vector<16xf32>
    %6 = vector.multi_reduction <add>, %5, %cst_1 [1] : vector<16x200xf32> to vector<16xf32>
    %7 = vector.shape_cast %6 : vector<16xf32> to vector<16x1xf32>
    %8 = vector.broadcast %7 : vector<16x1xf32> to vector<16x200xf32>
    %9 = arith.divf %5, %8 : vector<16x200xf32>
    %c0_2 = arith.constant 0 : index
    %c0_3 = arith.constant 0 : index
    %10 = vector.load %arg2[%c0_2, %c0_3] : memref<16x200xf32, #tpu.memory_space<vmem>>, vector<16x200xf32>
    tpu.vector_store %arg2[%c0_2, %c0_3], %9 {strides = array<i32>} : memref<16x200xf32, #tpu.memory_space<vmem>>, vector<16x200xf32>,
    return
  }
  func.func @transform_0(%arg0: i32) -> (i32, i32) {
    %c0_i32 = arith.constant 0 : i32
    %c0_i32_0 = arith.constant 0 : i32
    return %arg0, %c0_i32 : i32, i32
  }
  func.func @transform_1(%arg0: i32) -> (i32, i32) {
    %c0_i32 = arith.constant 0 : i32
    %c0_i32_0 = arith.constant 0 : i32
    return %arg0, %c0_i32 : i32, i32
  }
}

</mosaic_0001>

<bundles_post_ra>
// kernel: tpu_custom_call.1
= control target key start
LH: loop header
LB: loop body
LE: loop exit
PB: predicated region body
PF: predicated region fallthrough
CT: control target
= control target key end

     0   :  { %6 = vsyncpa [#allocation3], 0  ;;  %s672_s0 = inlined_call_operand.hbm [shape: f32[20,200], index: 0, kind: input, shape index: {}]   ;;  %s673_s1 = inlined_call_operand.hbm [shape: f32[20,200], index: 1, kind: output, shape index: {}]  }
   0x1   :  { %8 = vsyncpa [#allocation3 + $0x1], 0 }
   0x2   :  { %9 = vsyncpa [#allocation4], 0 }
   0x3   :  { %11 = vsyncpa [#allocation4 + $0x1], 0  ;;  %s492_s6 = smov 0   ;;  %s494_s7 = smov 0  }
   0x4   :  { %s496_s8 = smov 0   ;;  %s498_s9 = smov 0  }
   0x5 LB: > { %s513_s10 = sadd.s32 4294967295, %s474_s9   ;;  %s293_s11 = sadd.s32 4294967294, %s474_s9   ;;  %s474_s9 = sphi %s498_s9, %s683_s9   ;;  %s470_s8 = sphi %s496_s8, %s682_s8   ;;  %s466_s7 = sphi %s494_s7, %s681_s7   ;;  %s462_s6 = sphi %s492_s6, %s680_s6  }
   0x6   : > { %s517_s12 = sadd.s32 1, %s474_s9   ;;  %s24_s13 = sadd.s32 1, %s470_s8 }
   0x7   : > { %s21_s14 = ssub.s32 %s474_s9, %s517_s12  ;;  %p31_p0 = scmp.ne.s32.totalorder %s470_s8, %s466_s7 }
   0x8   : > { %p22_p1 = scmp.eq.s32.totalorder %s21_s14, 0  ;;  %p32_p2 = scmp.eq.s32.totalorder %s474_s9, 0 }
   0x9   : > { %p37_p3 = scmp.ne.s32.totalorder %s466_s7, %s462_s6  ;;  %p38_p4 = scmp.eq.s32.totalorder %s513_s10, 0 }
   0xa   : > { %s529_s15 = scalar_select %p22_p1, %s470_s8, %s24_s13  }
   0xb   : > { %p33_p5 = por %p32_p2, %p31_p0  ;;  %p531_p6 = por %p38_p4, %p37_p3 }
   0xc   : > { %p61_p7 = scmp.eq.s32.totalorder %s513_s10, 1  ;;  %p67_p8 = scmp.eq.s32.totalorder %s293_s11, 1 }
   0xd   : > { %p674_p11 = scmp.ge.s32.totalorder %s474_s9, 2 }
   0xe   : > { %p536_p9 = por %p61_p7, %p31_p0  ;;  %p540_p10 = por %p67_p8, %p37_p3 }
   0xf   : > { %83 = sbr.rel (%p674_p11) target bundleno = 57 (0x39), region = 16 }
  0x10   : > { %s677_s18 = scalar_select %p540_p10, 1, 0 }
  0x16   : > { %86 = sbr.rel (!%p33_p5) target bundleno = 57 (0x39), region = 20  ;;  %s87_s19 = sand.u32 (%p33_p5), 1, %s470_s8  }
  0x17   : > { %s297_s20 = sshll.u32 (%p33_p5), %s474_s9, 1  ;;  %s296_s21 = sshll.u32 (%p33_p5), %s87_s19, 5 }
  0x18   : > { %s93_s22 = ssub.s32 (%p33_p5), 3, %s297_s20  ;;  %s552_s25 = scalar_lea.sflag (%p33_p5), [#allocation3], %s87_s19 }
  0x19   : > { %p94_p12 = scmp.lt.s32.totalorder (%p33_p5), %s93_s22, 2  ;;  %s91_s26 = scalar_lea.vmem (%p33_p5), [#allocation2], %s296_s21 }
  0x1d   : > { %s685_s22 = smov (!%p94_p12, %s93_s22), 2 }
  0x1e   : > { %s549_s23 = sshll.u32 %s685_s22, 8 }
  0x1f   : > { %s99_s24 = ssub.s32 512, %s549_s23 }
  0x20   : > { %100 = vsyncadd %s552_s25, %s99_s24  ;;  %p300_p13 = scmp.ne.s32.totalorder %s549_s23, 0  ;;  %s321_s27 = sshll.u32 %s474_s9, 9 }
  0x21   : > { %s560_s30 = scalar_lea.hbm %s672_s0, %s321_s27  ;;  %s106_s2 = sshll.u32 %s91_s26, 4  ;;  %s562_s2 = int_to_ptr.vmem [resolvable:$true] %s106_s2 }
  0x22   : > { %s380_s3 = scalar_lea.hbm %s560_s30, %s549_s23  ;;  %s384_s11 = scalar_lea.hbm %s672_s0, 768 }
  0x23   : > { %p381_p0 = scmp.ne.s32.totalorder %s560_s30, %s380_s3  ;;  %p385_p3 = scmp.lt.u32.totalorder %s560_s30, %s672_s0 }
  0x24   : > { %p386_p4 = scmp.lt.u32.totalorder %s384_s11, %s380_s3  ;;  %p388_p7 = scmp.lt.u32.totalorder %s380_s3, %s560_s30 }
  0x25   : > { %p382_p1 = pnand %p381_p0, %p300_p13 }
  0x26   : > { %p387_p5 = por %p386_p4, %p385_p3 }
  0x27   : > { %p383_p2 = pneg %p382_p1 }
  0x28   : > { %p389_p8 = por %p388_p7, %p387_p5 }
  0x2a   : > { %p390_p12 = pnand %p389_p8, %p383_p2 }
  0x2c   : > { %393 = shalt.err (!%p390_p12)
}
  0x2d   : > { %s394_s19 = scalar_lea.vmem %s562_s2, %s549_s23  ;;  %s476_s20 = smov [#allocation2]  }
  0x2e   : > { %p395_p0 = scmp.ne.s32.totalorder %s562_s2, %s394_s19  ;;  %s398_s21 = sshll.u32 %s476_s20, 4  ;;  %s399_s21 = int_to_ptr.vmem [resolvable:$false] %s398_s21 }
  0x2f   : > { %s400_s22 = scalar_lea.vmem %s399_s21, 1024  ;;  %p401_p10 = scmp.lt.s32.totalorder %s562_s2, %s399_s21 }
  0x30   : > { %p396_p1 = pnand %p395_p0, %p300_p13  ;;  %p402_p3 = scmp.lt.s32.totalorder %s400_s22, %s394_s19 }
  0x32   : > { %p397_p11 = pneg %p396_p1  ;;  %p403_p4 = por %p402_p3, %p401_p10 }
  0x34   : > { %p404_p5 = pnand %p403_p4, %p397_p11 }
  0x36   : > { %407 = shalt.err (!%p404_p5)
}
  0x37   : > { %s477_s24 = smov 256   ;;  %s478_s26 = smov 16  }
  0x38   : > { %112 = dma.hbm_to_vmem [thread:$0]  (%p300_p13), %s560_s30, %s549_s23, %s562_s2, %s552_s25, %s477_s24, %s477_s24, %s478_s26  }
  0x39 PF: > { %p305_p2 = scmp.ge.s32.totalorder %s474_s9, 1  ;;  %p114_p7 = scmp.lt.s32.totalorder %s474_s9, 3 }
  0x3b   : > { %p115_p8 = pnand %p305_p2, %p114_p7 }
  0x3c   : > { %s592_s27 = sand.u32 (!%p115_p8), 1, %s466_s7  }
  0x3d   : > { %118 = sbr.rel (%p115_p8) target bundleno = 422 (0x1a6), region = 24  ;;  %s306_s28 = sshll.u32 (!%p115_p8), %s592_s27, 5 }
  0x3e   : > { %s121_s29 = scalar_lea.sflag (!%p115_p8), [#allocation3], %s592_s27  ;;  %s124_s3 = scalar_lea.vmem (!%p115_p8), [#allocation2], %s306_s28 }
  0x44   : > { %453 = dma.done.wait (%p531_p6), %s121_s29, 512  }
  0x45   : > { %455 = vsyncadd (%p531_p6), %s121_s29, 4294966784  ;;  %vm159_vm0 = vcmask 588800   ;;  %v155_v0 = vld [vmem:[%s124_s3] sm:$0xff]  ;;  %v156_v1 = vld [vmem:[%s124_s3 + $0x8] sm:$0xff]  ;;  %s142_s16 = scalar_lea.vmem [#allocation5], %s306_s28  ;;  %s199_s23 = scalar_lea.sflag [#allocation4], %s592_s27 }
  0x46   : > { %v160_v2 = vsel %vm159_vm0, %v156_v1, -inf  ;;  %v157_v3 = vld [vmem:[%s124_s3 + $0x10] sm:$0xff]  ;;  %v158_v4 = vld [vmem:[%s124_s3 + $0x18] sm:$0xff]  ;;  %s309_s25 = sshll.u32 (%p536_p9), %s513_s10, 1 }
  0x47   : > { %v161_v5 = vmax.f32 %v155_v0, %v160_v2  ;;  %v164_v6 = vsel %vm159_vm0, %v158_v4, -inf  ;;  %s207_s30 = ssub.s32 (%p536_p9), 3, %s309_s25 }
  0x48   : > { %v165_v7 = vmax.f32 %v157_v3, %v164_v6  ;;  %p208_p6 = scmp.lt.s32.totalorder (%p536_p9), %s207_s30, 2 }
  0x49   : > { %162 = vmax.xlane.f32.xlu0 %v161_v5 }
  0x4d   : > { %166 = vmax.xlane.f32.xlu0 %v165_v7 }
  0xd6   : > { %v163_v8 = vpop.xlane.xlu0 %162 }
  0xd7   : > { %v168_v9 = vsub.f32 %v155_v0, %v163_v8  ;;  %v169_v10 = vsub.f32 %v156_v1, %v163_v8 }
  0xd9   : > { %v172_v11 = vmul.f32 1.442695, %v168_v9  ;;  %v174_v12 = vmul.f32 1.442695, %v169_v10 }
  0xda   : > { %v167_v13 = vpop.xlane.xlu0 %166 }
  0xdb   : > { %368 = vpow2.f32 %v172_v11  ;;  %v170_v14 = vsub.f32 %v157_v3, %v167_v13  ;;  %v171_v15 = vsub.f32 %v158_v4, %v167_v13 }
  0xdc   : > { %370 = vpow2.f32 %v174_v12 }
  0xdd   : > { %v176_v16 = vmul.f32 1.442695, %v170_v14  ;;  %v178_v17 = vmul.f32 1.442695, %v171_v15 }
  0xdf   : > { %372 = vpow2.f32 %v176_v16 }
  0xe0   : > { %374 = vpow2.f32 %v178_v17 }
  0xe5   : > { %v369_v18 = vpop.eup %368 }
  0xe6   : > { %v371_v19 = vpop.eup %370 }
  0xe7   : > { %v180_v20 = vsel %vm159_vm0, %v371_v19, 0.0 }
  0xe8   : > { %v181_v21 = vadd.f32 %v369_v18, %v180_v20 }
  0xe9   : > { %v373_v22 = vpop.eup %372 }
  0xea   : > { %v375_v23 = vpop.eup %374  ;;  %182 = vadd.xlane.f32.xlu1 %v181_v21 }
  0xeb   : > { %v184_v24 = vsel %vm159_vm0, %v375_v23, 0.0 }
  0xec   : > { %v185_v25 = vadd.f32 %v373_v22, %v184_v24 }
  0xee   : > { %186 = vadd.xlane.f32.xlu1 %v185_v25 }
 0x177   : > { %v183_v26 = vpop.xlane.xlu1 %182 }
 0x178   : > { %376 = vrcp.f32 %v183_v26 }
 0x17b   : > { %v187_v27 = vpop.xlane.xlu1 %186 }
 0x17c   : > { %378 = vrcp.f32 %v187_v27 }
 0x182   : > { %v377_v28 = vpop.eup %376 }
 0x183   : > { %v189_v29 = vmul.f32 %v377_v28, %v369_v18  ;;  %v190_v30 = vmul.f32 %v377_v28, %v371_v19  ;;  %205 = sbr.rel (!%p536_p9) target bundleno = 422 (0x1a6), region = 32 }
 0x185   : > { %194 = vst [vmem:[%s142_s16] sm:$0xff] %v189_v29  ;;  %195 = vst.msk [vmem:[%s142_s16 + $0x8] sm:$0xff] %vm159_vm0, %v190_v30 }
 0x186   : > { %v379_v31 = vpop.eup %378 }
 0x187   : > { %v192_v32 = vmul.f32 %v379_v31, %v373_v22  ;;  %v193_v33 = vmul.f32 %v379_v31, %v375_v23 }
 0x189   : > { %196 = vst [vmem:[%s142_s16 + $0x10] sm:$0xff] %v192_v32  ;;  %197 = vst.msk [vmem:[%s142_s16 + $0x18] sm:$0xff] %vm159_vm0, %v193_v33 }
 0x18a   : > { %s687_s30 = smov (!%p208_p6, %s207_s30), 2 }
 0x18b   : > { %s614_s2 = sshll.u32 %s687_s30, 8 }
 0x18c   : > { %s213_s4 = ssub.s32 512, %s614_s2 }
 0x18d   : > { %214 = vsyncadd %s199_s23, %s213_s4  ;;  %p312_p10 = scmp.ne.s32.totalorder %s614_s2, 0  ;;  %s324_s5 = sshll.u32 %s513_s10, 9 }
 0x18e   : > { %s624_s13 = scalar_lea.hbm %s673_s1, %s324_s5  ;;  %s220_s14 = sshll.u32 %s142_s16, 4  ;;  %s626_s14 = int_to_ptr.vmem [resolvable:$true] %s220_s14 }
 0x18f   : > { %s408_s19 = scalar_lea.vmem %s626_s14, %s614_s2  ;;  %s479_s20 = smov [#allocation5]  }
 0x190   : > { %p409_p9 = scmp.ne.s32.totalorder %s626_s14, %s408_s19  ;;  %s412_s21 = sshll.u32 %s479_s20, 4  ;;  %s413_s21 = int_to_ptr.vmem [resolvable:$false] %s412_s21 }
 0x191   : > { %s414_s10 = scalar_lea.vmem %s413_s21, 1024  ;;  %p415_p12 = scmp.lt.s32.totalorder %s626_s14, %s413_s21 }
 0x192   : > { %p410_p11 = pnand %p409_p9, %p312_p10  ;;  %p416_p0 = scmp.lt.s32.totalorder %s414_s10, %s408_s19 }
 0x194   : > { %p411_p13 = pneg %p410_p11  ;;  %p417_p1 = por %p416_p0, %p415_p12 }
 0x196   : > { %p418_p3 = pnand %p417_p1, %p411_p13 }
 0x198   : > { %421 = shalt.err (!%p418_p3)
}
 0x199   : > { %s422_s22 = scalar_lea.hbm %s624_s13, %s614_s2  ;;  %s426_s28 = scalar_lea.hbm %s673_s1, 768 }
 0x19a   : > { %p423_p4 = scmp.ne.s32.totalorder %s624_s13, %s422_s22  ;;  %p427_p7 = scmp.lt.u32.totalorder %s624_s13, %s673_s1 }
 0x19b   : > { %p428_p8 = scmp.lt.u32.totalorder %s426_s28, %s422_s22  ;;  %p430_p9 = scmp.lt.u32.totalorder %s422_s22, %s624_s13 }
 0x19c   : > { %p424_p5 = pnand %p423_p4, %p312_p10 }
 0x19d   : > { %p429_p6 = por %p428_p8, %p427_p7 }
 0x19e   : > { %p425_p2 = pneg %p424_p5 }
 0x19f   : > { %p431_p11 = por %p430_p9, %p429_p6 }
 0x1a1   : > { %p432_p13 = pnand %p431_p11, %p425_p2 }
 0x1a3   : > { %435 = shalt.err (!%p432_p13)
}
 0x1a4   : > { %s480_s16 = smov 256   ;;  %s481_s25 = smov 16  }
 0x1a5   : > { %226 = dma.vmem_to_hbm [thread:$0]  (%p312_p10), %s626_s14, %s614_s2, %s624_s13, %s199_s23, %s480_s16, %s480_s16, %s481_s25  }
 0x1a6 PF: > { %s235_s30 = sand.u32 1, %s462_s6   ;;  %p678_p12 = scmp.ne.s32.totalorder %s677_s18, 0 }
 0x1a7   : > { %p679_p0 = scmp.ge.s32.totalorder %s474_s9, 2  ;;  %s236_s4 = scalar_lea.sflag [#allocation4], %s235_s30 }
 0x1a9   : > { %p328_p1 = pnand %p679_p0, %p678_p12 }
 0x1ab   : > { %457 = dma.done.wait (!%p328_p1), %s236_s4, 512  }
 0x1ac   : > { %459 = vsyncadd (!%p328_p1), %s236_s4, 4294966784  ;;  %p14_p3 = scmp.ge.s32.totalorder %s517_s12, 4   ;;  %s680_s6 = smov %s466_s7 }
 0x1ad   : > { %s681_s7 = smov %s470_s8  ;;  %s682_s8 = smov %s529_s15 }
 0x1ae   : > { %s683_s9 = smov %s517_s12  ;;  %16 = sbr.rel (!%p14_p3) target bundleno = 5 (0x5), region = 69 }
 0x1b5   :  { %241 = vsyncpa [#allocation3], 1 }
 0x1b6   :  { %243 = vsyncpa [#allocation3 + $0x1], 1 }
 0x1b7   :  { %244 = vsyncpa [#allocation4], 1 }
 0x1b8   :  { %246 = vsyncpa [#allocation4 + $0x1], 1 }

</bundles_post_ra>
